<compile_context>
chip_gen: v6e
topology: v6e:2x2x1
jax: 0.10.0
libtpu: 0.0.40
codegen_flags: <defaults>
</compile_context>

<pallas_src>
import jax
import jax.numpy as jnp
from jax.experimental import pallas as pl
from jax.experimental.pallas import tpu as pltpu


def sparse_attn_kernel(h_ref, w_ref, ctx_ref, attn_ref):
    h = h_ref[...]                                   # (TB, S, H), native dtype
    hf = h.astype(jnp.float32)
    w = w_ref[...].astype(jnp.float32)               # (1, H)
    TB, S, H = hf.shape

    # scores z_i = <h_i, w>   (VPU multiply + lane reduce; keeps the MXU free)
    z = jnp.sum(hf * w, axis=-1)                     # (TB, S)

    # ---- sparsemax over the sequence axis: ONE (TB, S, S) pairwise pass ----
    zi = z[:, :, None]                               # (TB, S, 1)
    zj = z[:, None, :]                               # (TB, 1, S)
    idx_i = jax.lax.broadcasted_iota(jnp.int32, (S, S), 0)[None, :, :]
    idx_j = jax.lax.broadcasted_iota(jnp.int32, (S, S), 1)[None, :, :]
    # "j sorts at-or-before i" in (value desc, index asc) order (includes j==i)
    mask = (zj > zi) | ((zj == zi) & (idx_j <= idx_i))            # bool (TB,S,S)

    count = jnp.sum(mask.astype(jnp.float32), axis=2)             # (TB, S) = rank_i + 1
    cums = jnp.sum(jnp.where(mask, zj, 0.0), axis=2)              # (TB, S) prefix-sum at rank_i

    # support_i <=> sorted_z[r] > (cumsum_sorted[r] - 1) / r   at r = rank_i + 1
    support = (1.0 + count * z) > cums                            # bool (TB, S)
    k = jnp.sum(support.astype(jnp.float32), axis=1, keepdims=True)       # (TB, 1), >= 1
    cums_at_k = jnp.sum(jnp.where(support, z, 0.0), axis=1, keepdims=True)  # (TB, 1)
    tau = (cums_at_k - 1.0) / k
    weights = jnp.maximum(z - tau, 0.0)                           # (TB, S)

    # ---- outputs -----------------------------------------------------------
    attn_ref[...] = weights                          # lane-dense (TB, S) store

    # context[b, :] = sum_s weights[b, s] * h[b, s, :]   (batched MXU matmul)
    ctx = jax.lax.dot_general(
        weights[:, None, :], hf,                     # (TB,1,S) x (TB,S,H)
        dimension_numbers=(((2,), (1,)), ((0,), (0,))),
        preferred_element_type=jnp.float32)          # (TB, 1, H)
    ctx_ref[...] = ctx[:, 0, :]


def _choose_block_b(B, S, H, in_itemsize, budget_bytes=12 * 1024 * 1024):
    """Pick a batch tile that (a) divides B when possible, (b) keeps the
    (TB,S,S) intermediates plus the double-buffered input block within a VMEM
    budget safe on v5e/v6e/v7x, and (c) keeps 2-D output blocks sublane-legal
    (TB == B or 8 | TB)."""
    def fits(tb):
        need = (2 * tb * S * H * in_itemsize    # double-buffered input DMA block
                + tb * S * H * 4                # in-kernel f32 copy of the tile
                + 2 * tb * S * S * 4            # pairwise mask + masked values
                + 8 * tb * S * 4)               # small (TB,S) vectors
        return need <= budget_bytes

    if fits(B):
        return B
    cands = [tb for tb in range(8, B, 8) if B % tb == 0 and fits(tb)]
    if cands:
        return max(cands)
    return 8 if B % 8 == 0 else B


def sparse_attention_layer(hidden_states, weight_vector, *, block_b=None):
    B, S, H = hidden_states.shape
    w2d = weight_vector.reshape(1, H).astype(jnp.float32)

    if block_b is None:
        block_b = _choose_block_b(B, S, H, jnp.dtype(hidden_states.dtype).itemsize)
    grid = (pl.cdiv(B, block_b),)

    ctx, attn = pl.pallas_call(
        sparse_attn_kernel,
        grid=grid,
        in_specs=[
            pl.BlockSpec((block_b, S, H), lambda b: (b, 0, 0)),
            pl.BlockSpec((1, H), lambda b: (0, 0)),
        ],
        out_specs=(
            pl.BlockSpec((block_b, H), lambda b: (b, 0)),
            pl.BlockSpec((block_b, S), lambda b: (b, 0)),   # lane-dense weights
        ),
        out_shape=(
            jax.ShapeDtypeStruct((B, H), jnp.float32),
            jax.ShapeDtypeStruct((B, S), jnp.float32),
        ),
        compiler_params=pltpu.CompilerParams(
            dimension_semantics=("parallel",),
            vmem_limit_bytes=32 * 1024 * 1024,
        ),
    )(hidden_states, w2d)

    # Restore PyTorch's (B, S, 1) attention-weights shape outside the kernel
    # (free metadata reshape; keeps the in-kernel store lane-dense).
    return ctx, attn[:, :, None]


def _reference(hidden_states, weight_vector):
    # Pure-JAX mirror of the PyTorch forward (correctness check).
    z = jnp.einsum('bsh,h->bs', hidden_states.astype(jnp.float32),
                   weight_vector.astype(jnp.float32))
    sorted_z = -jnp.sort(-z, axis=1)
    cums = jnp.cumsum(sorted_z, axis=1)
    rng = jnp.arange(1, z.shape[1] + 1, dtype=z.dtype)[None, :]
    thresh = (cums - 1.0) / rng
    k = jnp.sum((sorted_z > thresh).astype(z.dtype), axis=1, keepdims=True)
    cums_k = jnp.take_along_axis(cums, k.astype(jnp.int32) - 1, axis=1)
    tau = (cums_k - 1.0) / k
    w = jnp.clip(z - tau, 0.0, None)[:, :, None]
    ctx = jnp.sum(w * hidden_states.astype(jnp.float32), axis=1)
    return ctx, w


if __name__ == "__main__":
    B, S, H = 2, 8, 32
    key = jax.random.PRNGKey(0)
    k1, k2 = jax.random.split(key)
    hidden_states = jax.random.normal(k1, (B, S, H), dtype=jnp.float32)
    weight_vector = jax.random.normal(k2, (H,), dtype=jnp.float32)  # nn.Parameter(randn(H))

    ctx, attn = sparse_attention_layer(hidden_states, weight_vector)
    jax.block_until_ready((ctx, attn))

    ctx_ref, attn_ref = _reference(hidden_states, weight_vector)
    assert ctx.shape == (B, H) and attn.shape == (B, S, 1)
    assert jnp.allclose(ctx, ctx_ref, atol=1e-5, rtol=1e-5)
    assert jnp.allclose(attn, attn_ref, atol=1e-5, rtol=1e-5)

    print("KERNEL_OK")
</pallas_src>

<mosaic_0001>
module attributes {stable_mosaic.version = 11 : i64} {
  func.func @sparse_attn_kernel(%arg0: i32, %arg1: memref<2x8x32xf32, #tpu.memory_space<vmem>>, %arg2: memref<1x32xf32, #tpu.memory_space<vmem>>, %arg3: memref<2x32xf32, #tpu.memory_space<vmem>>, %arg4: memref<2x8xf32, #tpu.memory_space<vmem>>) attributes {dimension_semantics = [#tpu.dimension_semantics<parallel>], iteration_bounds = array<i64: 1>, scalar_prefetch = 0 : i64, scratch_operands = 0 : i64, tpu.core_type = #tpu.core_type<tc>, window_params = [{transform_indices = @transform_0, window_bounds = array<i64: 2, 8, 32>}, {pipeline_mode = #tpu.pipeline_mode<synchronous>, transform_indices = @transform_1, window_bounds = array<i64: 1, 32>}, {transform_indices = @transform_2, window_bounds = array<i64: 2, 32>}, {transform_indices = @transform_3, window_bounds = array<i64: 2, 8>}]} {
    %c0 = arith.constant 0 : index
    %c0_0 = arith.constant 0 : index
    %c0_1 = arith.constant 0 : index
    %0 = vector.load %arg1[%c0, %c0_0, %c0_1] : memref<2x8x32xf32, #tpu.memory_space<vmem>>, vector<2x8x32xf32>
    %c0_2 = arith.constant 0 : index
    %c0_3 = arith.constant 0 : index
    %1 = vector.load %arg2[%c0_2, %c0_3] : memref<1x32xf32, #tpu.memory_space<vmem>>, vector<1x32xf32>
    %2 = vector.shape_cast %1 : vector<1x32xf32> to vector<1x1x32xf32>
    %3 = vector.broadcast %2 : vector<1x1x32xf32> to vector<2x8x32xf32>
    %4 = arith.mulf %0, %3 : vector<2x8x32xf32>
    %cst = arith.constant dense<0.000000e+00> : vector<2x8xf32>
    %5 = vector.multi_reduction <add>, %4, %cst [2] : vector<2x8x32xf32> to vector<2x8xf32>
    %6 = vector.shape_cast %5 : vector<2x8xf32> to vector<2x8x1xf32>
    %7 = vector.shape_cast %5 : vector<2x8xf32> to vector<2x1x8xf32>
    %8 = tpu.iota {dimensions = array<i32: 0>} : vector<8x8xi32>
    %9 = vector.shape_cast %8 : vector<8x8xi32> to vector<1x8x8xi32>
    %10 = tpu.iota {dimensions = array<i32: 1>} : vector<8x8xi32>
    %11 = vector.shape_cast %10 : vector<8x8xi32> to vector<1x8x8xi32>
    %12 = vector.broadcast %7 : vector<2x1x8xf32> to vector<2x8x8xf32>
    %13 = vector.broadcast %6 : vector<2x8x1xf32> to vector<2x8x8xf32>
    %14 = arith.cmpf ogt, %12, %13 : vector<2x8x8xf32>
    %15 = vector.broadcast %7 : vector<2x1x8xf32> to vector<2x8x8xf32>
    %16 = vector.broadcast %6 : vector<2x8x1xf32> to vector<2x8x8xf32>
    %17 = arith.cmpf oeq, %15, %16 : vector<2x8x8xf32>
    %18 = arith.cmpi sle, %11, %9 : vector<1x8x8xi32>
    %19 = vector.broadcast %18 : vector<1x8x8xi1> to vector<2x8x8xi1>
    %20 = arith.andi %17, %19 : vector<2x8x8xi1>
    %21 = arith.ori %14, %20 : vector<2x8x8xi1>
    %22 = arith.extui %21 : vector<2x8x8xi1> to vector<2x8x8xi32>
    %23 = arith.sitofp %22 : vector<2x8x8xi32> to vector<2x8x8xf32>
    %cst_4 = arith.constant dense<0.000000e+00> : vector<2x8xf32>
    %24 = vector.multi_reduction <add>, %23, %cst_4 [2] : vector<2x8x8xf32> to vector<2x8xf32>
    %cst_5 = arith.constant 0.000000e+00 : f32
    %25 = vector.shape_cast %7 : vector<2x1x8xf32> to vector<2x1x8xf32>
    %26 = vector.broadcast %25 : vector<2x1x8xf32> to vector<2x8x8xf32>
    %27 = vector.broadcast %cst_5 : f32 to vector<2x8x8xf32>
    %28 = arith.select %21, %26, %27 : vector<2x8x8xi1>, vector<2x8x8xf32>
    %cst_6 = arith.constant dense<0.000000e+00> : vector<2x8xf32>
    %29 = vector.multi_reduction <add>, %28, %cst_6 [2] : vector<2x8x8xf32> to vector<2x8xf32>
    %30 = arith.mulf %24, %5 : vector<2x8xf32>
    %cst_7 = arith.constant 1.000000e+00 : f32
    %31 = vector.broadcast %cst_7 : f32 to vector<2x8xf32>
    %32 = arith.addf %31, %30 : vector<2x8xf32>
    %33 = arith.cmpf ogt, %32, %29 : vector<2x8xf32>
    %34 = arith.extui %33 : vector<2x8xi1> to vector<2x8xi32>
    %35 = arith.sitofp %34 : vector<2x8xi32> to vector<2x8xf32>
    %cst_8 = arith.constant dense<0.000000e+00> : vector<2xf32>
    %36 = vector.multi_reduction <add>, %35, %cst_8 [1] : vector<2x8xf32> to vector<2xf32>
    %37 = vector.shape_cast %36 : vector<2xf32> to vector<2x1xf32>
    %cst_9 = arith.constant 0.000000e+00 : f32
    %38 = vector.broadcast %cst_9 : f32 to vector<2x8xf32>
    %39 = arith.select %33, %5, %38 : vector<2x8xi1>, vector<2x8xf32>
    %cst_10 = arith.constant dense<0.000000e+00> : vector<2xf32>
    %40 = vector.multi_reduction <add>, %39, %cst_10 [1] : vector<2x8xf32> to vector<2xf32>
    %41 = vector.shape_cast %40 : vector<2xf32> to vector<2x1xf32>
    %cst_11 = arith.constant 1.000000e+00 : f32
    %42 = vector.broadcast %cst_11 : f32 to vector<2x1xf32>
    %43 = arith.subf %41, %42 : vector<2x1xf32>
    %44 = arith.divf %43, %37 : vector<2x1xf32>
    %45 = vector.broadcast %44 : vector<2x1xf32> to vector<2x8xf32>
    %46 = arith.subf %5, %45 : vector<2x8xf32>
    %cst_12 = arith.constant 0.000000e+00 : f32
    %47 = vector.broadcast %cst_12 : f32 to vector<2x8xf32>
    %48 = arith.maximumf %46, %47 : vector<2x8xf32>
    %c0_13 = arith.constant 0 : index
    %c0_14 = arith.constant 0 : index
    %49 = vector.load %arg4[%c0_13, %c0_14] : memref<2x8xf32, #tpu.memory_space<vmem>>, vector<2x8xf32>
    tpu.vector_store %arg4[%c0_13, %c0_14], %48 {strides = array<i32>} : memref<2x8xf32, #tpu.memory_space<vmem>>, vector<2x8xf32>,
    %50 = vector.shape_cast %48 : vector<2x8xf32> to vector<2x1x8xf32>
    %cst_15 = arith.constant dense<0.000000e+00> : vector<2x1x32xf32>
    %51 = tpu.matmul %50, %0, %cst_15 {dimension_numbers = #tpu.dot_dimension_numbers<[2], [1], [1], [2], [0, 0, 0, 1, 1, 2], [0], [0]>} : vector<2x1x8xf32>, vector<2x8x32xf32>, vector<2x1x32xf32> -> vector<2x1x32xf32>
    %52 = vector.shape_cast %51 : vector<2x1x32xf32> to vector<2x32xf32>
    %c0_16 = arith.constant 0 : index
    %c0_17 = arith.constant 0 : index
    %53 = vector.load %arg3[%c0_16, %c0_17] : memref<2x32xf32, #tpu.memory_space<vmem>>, vector<2x32xf32>
    tpu.vector_store %arg3[%c0_16, %c0_17], %52 {strides = array<i32>} : memref<2x32xf32, #tpu.memory_space<vmem>>, vector<2x32xf32>,
    return
  }
  func.func @transform_0(%arg0: i32) -> (i32, i32, i32) {
    %c0_i32 = arith.constant 0 : i32
    %c0_i32_0 = arith.constant 0 : i32
    %c0_i32_1 = arith.constant 0 : i32
    return %arg0, %c0_i32, %c0_i32_0 : i32, i32, i32
  }
  func.func @transform_1(%arg0: i32) -> (i32, i32) {
    %c0_i32 = arith.constant 0 : i32
    %c0_i32_0 = arith.constant 0 : i32
    %c0_i32_1 = arith.constant 0 : i32
    return %c0_i32, %c0_i32_0 : i32, i32
  }
  func.func @transform_2(%arg0: i32) -> (i32, i32) {
    %c0_i32 = arith.constant 0 : i32
    %c0_i32_0 = arith.constant 0 : i32
    return %arg0, %c0_i32 : i32, i32
  }
  func.func @transform_3(%arg0: i32) -> (i32, i32) {
    %c0_i32 = arith.constant 0 : i32
    %c0_i32_0 = arith.constant 0 : i32
    return %arg0, %c0_i32 : i32, i32
  }
}

</mosaic_0001>

<bundles_post_ra>
// kernel: tpu_custom_call.1
= control target key start
LH: loop header
LB: loop body
LE: loop exit
PB: predicated region body
PF: predicated region fallthrough
CT: control target
= control target key end

     0   :  { %9 = vsyncpa [#allocation3], 0  ;;  %s1439_s0 = inlined_call_operand.hbm [shape: f32[2,8,32], index: 0, kind: input, shape index: {}]   ;;  %s1440_s1 = inlined_call_operand.vmem [shape: f32[1,32], index: 1, kind: input, shape index: {}]   ;;  %s1441_s2 = inlined_call_operand.hbm [shape: f32[2,32], index: 2, kind: output, shape index: {0}]   ;;  %s1442_s3 = inlined_call_operand.hbm [shape: f32[2,8], index: 3, kind: output, shape index: {1}]  }
   0x1   :  { %10 = vsyncpa [#allocation4], 0 }
   0x2   :  { %11 = vsyncpa [#allocation7], 0  ;;  %s1035_s12 = smov [#allocation2]  }
   0x3   :  { %s17_s13 = sshll.u32 %s1035_s12, 4  ;;  %s18_s13 = int_to_ptr.vmem [resolvable:$true] %s17_s13 }
   0x4   :  { %s977_s14 = scalar_lea.vmem %s18_s13, 256  ;;  %p982_p1 = scmp.lt.s32.totalorder %s18_s13, %s18_s13 }
   0x5   :  { %p978_p0 = scmp.ne.s32.totalorder %s18_s13, %s977_s14  ;;  %p983_p2 = scmp.lt.s32.totalorder %s977_s14, %s977_s14 }
   0x7   :  { %p984_p3 = por %p983_p2, %p982_p1 }
   0x9   :  { %p985_p4 = pnand %p984_p3, %p978_p0 }
   0xb   :  { %988 = shalt.err (!%p985_p4)
}
   0xc   :  { %s1036_s15 = smov 128   ;;  %s1037_s16 = smov 8  }
   0xd   :  { %23 = dma.hbm_to_vmem [thread:$0]  %s1439_s0, 256, %s18_s13, [#allocation3], %s1036_s15, %s1036_s15, %s1037_s16  }
   0xe   :  { %1029 = dma.done.wait [#allocation3], 256  }
   0xf   :  { %1030 = vsyncadd [#allocation3], 4294967040  ;;  %v47_v0 = vlaneseq  ;;  %v1038_v1 = vmov 0   ;;  %v29_v9 = vld [vmem:[#allocation2] sm:$0xff]  ;;  %vm40_vm1 = vcmask 261120   ;;  %v30_v11 = vld [vmem:[#allocation2 + $0x8] sm:$0xff] }
  0x10   :  { %925 = vset.pattern.permute.xlu1 %v1038_v1  ;;  %931 = vset.pattern.permute.xlu0 %v1038_v1  ;;  %v881_v10 = vld [vmem:[%s1440_s1] ss:$0 sm:$0xff]  ;;  %v1039_v24 = vmov 0.0   ;;  %v1453_v48 = vmov 0  ;;  %v1455_v50 = vmov 0  ;;  %s1041_s1 = smov [#allocation6]  }
  0x11   :  { %v48_v2 = vshrl.u32 %v47_v0, 7  ;;  %v50_v3 = vand.u32 127, %v47_v0  ;;  %v38_v12 = vmul.f32 %v881_v10, %v29_v9  ;;  %v39_v13 = vmul.f32 %v881_v10, %v30_v11  ;;  %907 = vmatprep.subr.mxu0 %v1039_v24  ;;  %912 = vmatprep.subr.mxu1 %v1039_v24  ;;  %s868_s20 = sshll.u32 %s1041_s1, 4  ;;  %s869_s20 = int_to_ptr.vmem [resolvable:$true] %s868_s20 }
  0x12   :  { %908 = vmatpush3.msra.mxu0 %v29_v9  ;;  %913 = vmatpush3.msra.mxu1 %v30_v11  ;;  %v1461_v0 = vmov 0  ;;  %v1465_v10 = vmov 0  ;;  %s989_s21 = scalar_lea.vmem %s869_s20, 32  ;;  %p994_p6 = scmp.lt.s32.totalorder %s869_s20, %s869_s20 }
  0x13   :  { %v1066_v4 = vsub.s32 0, %v48_v2  ;;  %vm165_vm0 = vcmp.le.s32.totalorder %v50_v3, %v48_v2  ;;  %v1068_v5 = vsub.s32 %v50_v3, %v48_v2  ;;  %v1070_v6 = vsub.s32 1, %v48_v2  ;;  %p990_p5 = scmp.ne.s32.totalorder %s869_s20, %s989_s21  ;;  %p995_p7 = scmp.lt.s32.totalorder %s989_s21, %s989_s21 }
  0x14   :  { %v168_v7 = vsel %vm165_vm0, 1, %v1038_v1  ;;  %v1077_v15 = vsub.s32 3, %v48_v2  ;;  %v41_v16 = vsel %vm40_vm1, %v38_v12, 0.0  ;;  %v44_v17 = vsel %vm40_vm1, %v39_v13, 0.0 }
  0x15   :  { %v172_v8 = vrot.slane %v168_v7, %v1066_v4  ;;  %v179_v14 = vrot.slane %v168_v7, %v1070_v6  ;;  %42 = vadd.xlane.f32.xlu0 %v41_v16  ;;  %v71_v19 = vsub.s32 4, %v48_v2  ;;  %v1080_v21 = vsub.s32 5, %v48_v2  ;;  %p996_p8 = por %p995_p7, %p994_p6 }
  0x16   :  { %v193_v18 = vrot.slane %v168_v7, %v1077_v15  ;;  %v1083_v23 = vsub.s32 6, %v48_v2  ;;  %v1088_v26 = vsub.s32 7, %v48_v2  ;;  %v63_v28 = vsub.s32 2, %v48_v2 }
  0x17   :  { %174 = vbcast.lane.b32.xlu1 %v172_v8, 256  ;;  %v200_v20 = vrot.slane %v168_v7, %v71_v19  ;;  %v207_v22 = vrot.slane %v168_v7, %v1080_v21  ;;  %v1463_v2 = vmov 0  ;;  %v1467_v12 = vmov 0  ;;  %p997_p9 = pnand %p996_p8, %p990_p5 }
  0x18   :  { %v214_v25 = vrot.slane %v168_v7, %v1083_v23  ;;  %v221_v27 = vrot.slane %v168_v7, %v1088_v26  ;;  %v186_v29 = vrot.slane %v168_v7, %v63_v28 }
  0x19   :  { %45 = vadd.xlane.f32.xlu0 %v44_v17 }
  0x1b   :  { %181 = vbcast.lane.b32.xlu1 %v179_v14, 256 }
  0x1f   :  { %195 = vbcast.lane.b32.xlu1 %v193_v18, 256 }
  0x23   :  { %202 = vbcast.lane.b32.xlu1 %v200_v20, 256 }
  0x27   :  { %209 = vbcast.lane.b32.xlu1 %v207_v22, 256 }
  0x2b   :  { %216 = vbcast.lane.b32.xlu1 %v214_v25, 256 }
  0x2f   :  { %223 = vbcast.lane.b32.xlu1 %v221_v27, 256  ;;  %188 = vbcast.lane.b32.xlu0 %v186_v29, 256 }
  0x89   :  { %v175_v30 = vpop.permute.xlu1 %174 }
  0x8a   :  { %vm225_vm5 = vcmp.ne.s32.totalorder %v175_v30, 0 }
  0x8d   :  { %v182_v34 = vpop.permute.xlu1 %181 }
  0x8e   :  { %vm226_vm2 = vcmp.ne.s32.totalorder %v182_v34, 0 }
  0x91   :  { %v196_v39 = vpop.permute.xlu1 %195 }
  0x95   :  { %v203_v52 = vpop.permute.xlu1 %202 }
  0x99   :  { %v210_v63 = vpop.permute.xlu1 %209 }
  0x9d   :  { %v217_v13 = vpop.permute.xlu1 %216 }
  0x9e   :  { %v1091_v31 = vpop.xlane.xlu0 %42 }
  0x9f   :  { %v56_v32 = vrot.slane %v1091_v31, %v1066_v4  ;;  %v60_v33 = vrot.slane %v1091_v31, %v1070_v6  ;;  %v64_v36 = vrot.slane %v1091_v31, %v63_v28  ;;  %v72_v47 = vrot.slane %v1091_v31, %v71_v19 }
  0xa0   :  { %v68_v55 = vrot.slane %v1091_v31, %v1077_v15  ;;  %v76_v62 = vrot.slane %v1091_v31, %v1080_v21  ;;  %v80_v9 = vrot.slane %v1091_v31, %v1083_v23 }
  0xa1   :  { %vm149_vm3 = vcmp.eq.f32.partialorder %v1091_v31, %v56_v32  ;;  %vm150_vm4 = vcmp.eq.f32.partialorder %v1091_v31, %v60_v33  ;;  %vm133_vm6 = vcmp.gt.f32.partialorder %v1091_v31, %v56_v32  ;;  %vm134_vm7 = vcmp.gt.f32.partialorder %v1091_v31, %v60_v33  ;;  %v224_v30 = vpop.permute.xlu1 %223 }
  0xa2   :  { %v1097_v35 = vpop.xlane.xlu0 %45  ;;  %vm233_vm8 = vmand %vm149_vm3, %vm225_vm5  ;;  %vm151_vm11 = vcmp.eq.f32.partialorder %v1091_v31, %v64_v36  ;;  %vm135_vm0 = vcmp.gt.f32.partialorder %v1091_v31, %v64_v36 }
  0xa3   :  { %v96_v37 = vrot.slane %v1097_v35, %v63_v28  ;;  %vm234_vm9 = vmand %vm150_vm4, %vm226_vm2  ;;  %v88_v38 = vrot.slane %v1097_v35, %v1066_v4  ;;  %v92_v42 = vrot.slane %v1097_v35, %v1070_v6  ;;  %v104_v49 = vrot.slane %v1097_v35, %v71_v19 }
  0xa4   :  { %vm1109_vm10 = vmor %vm133_vm6, %vm233_vm8  ;;  %v100_v57 = vrot.slane %v1097_v35, %v1077_v15  ;;  %v108_v1 = vrot.slane %v1097_v35, %v1080_v21  ;;  %v112_v11 = vrot.slane %v1097_v35, %v1083_v23  ;;  %v116_v23 = vrot.slane %v1097_v35, %v1088_v26 }
  0xa5   :  { %vm1116_vm13 = vmor %vm134_vm7, %vm234_vm9  ;;  %v882_v44 = vsel %vm1109_vm10, 1.0, %v1039_v24  ;;  %vm159_vm14 = vcmp.eq.f32.partialorder %v1097_v35, %v96_v37  ;;  %vm157_vm3 = vcmp.eq.f32.partialorder %v1097_v35, %v88_v38  ;;  %vm143_vm4 = vcmp.gt.f32.partialorder %v1097_v35, %v96_v37 }
  0xa6   :  { %v189_v40 = vpop.permute.xlu0 %188  ;;  %v883_v45 = vsel %vm1116_vm13, 1.0, %v1039_v24  ;;  %vm158_vm7 = vcmp.eq.f32.partialorder %v1097_v35, %v92_v42  ;;  %vm141_vm9 = vcmp.gt.f32.partialorder %v1097_v35, %v88_v38  ;;  %v455_v17 = vsel %vm1109_vm10, %v1091_v31, 0.0 }
  0xa7   :  { %vm227_vm12 = vcmp.ne.s32.totalorder %v189_v40, 0  ;;  %v926_v46 = vpack.i.bf16 %v883_v45, %v882_v44  ;;  %vm147_vm10 = vcmp.gt.f32.partialorder %v1097_v35, %v112_v11  ;;  %v84_v28 = vrot.slane %v1091_v31, %v1088_v26 }
  0xa8   :  { %vm235_vm15 = vmand %vm151_vm11, %vm227_vm12  ;;  %vm142_vm11 = vcmp.gt.f32.partialorder %v1097_v35, %v92_v42  ;;  %v456_v26 = vsel %vm1116_vm13, %v1091_v31, 0.0 }
  0xa9   :  { %vm243_vm1 = vmand %vm159_vm14, %vm227_vm12  ;;  %927 = vperm.xlu1 %925, %v926_v46   ;;  %vm229_vm14 = vcmp.ne.s32.totalorder %v203_v52, 0 }
  0xaa   :  { %vm1131_vm6 = vmor %vm135_vm0, %vm235_vm15  ;;  %vm153_vm0 = vcmp.eq.f32.partialorder %v1091_v31, %v72_v47 }
  0xab   :  { %v1454_v48 = vsel %vm1131_vm6, 4294967295, %v1453_v48  ;;  %vm1137_vm8 = vmor %vm143_vm4, %vm243_vm1  ;;  %v884_v51 = vsel %vm1131_vm6, 1.0, %v1039_v24  ;;  %vm161_vm4 = vcmp.eq.f32.partialorder %v1097_v35, %v104_v49 }
  0xac   :  { %v1456_v50 = vsel %vm1137_vm8, 4294967295, %v1455_v50  ;;  %v892_v53 = vsel %vm1137_vm8, 1.0, %v1039_v24  ;;  %vm241_vm12 = vmand %vm157_vm3, %vm225_vm5  ;;  %vm145_vm5 = vcmp.gt.f32.partialorder %v1097_v35, %v104_v49 }
  0xad   :  { %vm242_vm15 = vmand %vm158_vm7, %vm226_vm2  ;;  %v937_v54 = vpack.i.bf16 %v892_v53, %v884_v51  ;;  %vm137_vm2 = vcmp.gt.f32.partialorder %v1091_v31, %v72_v47  ;;  %vm228_vm7 = vcmp.ne.s32.totalorder %v196_v39, 0 }
  0xae   :  { %vm1154_vm1 = vmor %vm141_vm9, %vm241_vm12 }
  0xaf   :  { %vm1161_vm6 = vmor %vm142_vm11, %vm242_vm15  ;;  %v890_v59 = vsel %vm1154_vm1, 1.0, %v1039_v24  ;;  %938 = vperm.xlu1 %925, %v937_v54   ;;  %vm152_vm11 = vcmp.eq.f32.partialorder %v1091_v31, %v68_v55  ;;  %vm160_vm15 = vcmp.eq.f32.partialorder %v1097_v35, %v100_v57  ;;  %v463_v25 = vsel %vm1154_vm1, %v1097_v35, 0.0 }
  0xb0   :  { %v891_v60 = vsel %vm1161_vm6, 1.0, %v1039_v24  ;;  %vm237_vm3 = vmand %vm153_vm0, %vm229_vm14  ;;  %vm164_vm1 = vcmp.eq.f32.partialorder %v1097_v35, %v116_v23  ;;  %v464_v36 = vsel %vm1161_vm6, %v1097_v35, 0.0 }
  0xb1   :  { %v932_v61 = vpack.i.bf16 %v891_v60, %v890_v59  ;;  %vm245_vm9 = vmand %vm161_vm4, %vm229_vm14  ;;  %vm136_vm14 = vcmp.gt.f32.partialorder %v1091_v31, %v68_v55  ;;  %vm144_vm4 = vcmp.gt.f32.partialorder %v1097_v35, %v100_v57 }
  0xb2   :  { %vm1178_vm12 = vmor %vm137_vm2, %vm237_vm3  ;;  %vm230_vm3 = vcmp.ne.s32.totalorder %v210_v63, 0 }
  0xb3   :  { %v1462_v0 = vsel %vm1178_vm12, 4294967295, %v1461_v0  ;;  %933 = vperm.xlu0 %931, %v932_v61   ;;  %vm1185_vm0 = vmor %vm145_vm5, %vm245_vm9  ;;  %v886_v3 = vsel %vm1178_vm12, 1.0, %v1039_v24  ;;  %vm154_vm9 = vcmp.eq.f32.partialorder %v1091_v31, %v76_v62  ;;  %vm162_vm12 = vcmp.eq.f32.partialorder %v1097_v35, %v108_v1 }
  0xb4   :  { %v1464_v2 = vsel %vm1185_vm0, 4294967295, %v1463_v2  ;;  %v894_v7 = vsel %vm1185_vm0, 1.0, %v1039_v24  ;;  %vm236_vm2 = vmand %vm152_vm11, %vm228_vm7 }
  0xb5   :  { %v947_v8 = vpack.i.bf16 %v894_v7, %v886_v3  ;;  %vm244_vm5 = vmand %vm160_vm15, %vm228_vm7  ;;  %vm138_vm7 = vcmp.gt.f32.partialorder %v1091_v31, %v76_v62  ;;  %vm146_vm15 = vcmp.gt.f32.partialorder %v1097_v35, %v108_v1 }
  0xb6   :  { %vm1202_vm8 = vmor %vm136_vm14, %vm236_vm2  ;;  %vm231_vm2 = vcmp.ne.s32.totalorder %v217_v13, 0 }
  0xb7   :  { %v1466_v10 = vsel %vm1202_vm8, 4294967295, %v1465_v10  ;;  %948 = vperm.xlu0 %931, %v947_v8   ;;  %vm1209_vm11 = vmor %vm144_vm4, %vm244_vm5  ;;  %v885_v14 = vsel %vm1202_vm8, 1.0, %v1039_v24  ;;  %vm155_vm5 = vcmp.eq.f32.partialorder %v1091_v31, %v80_v9 }
  0xb8   :  { %v1468_v12 = vsel %vm1209_vm11, 4294967295, %v1467_v12  ;;  %v893_v15 = vsel %vm1209_vm11, 1.0, %v1039_v24  ;;  %vm238_vm14 = vmand %vm154_vm9, %vm230_vm3  ;;  %vm163_vm11 = vcmp.eq.f32.partialorder %v1097_v35, %v112_v11  ;;  %vm1483_vm6 = vnez %v1466_v10 }
  0xb9   :  { %v942_v16 = vpack.i.bf16 %v893_v15, %v885_v14  ;;  %vm246_vm4 = vmand %vm162_vm12, %vm230_vm3  ;;  %vm139_vm12 = vcmp.gt.f32.partialorder %v1091_v31, %v80_v9  ;;  %v458_v41 = vsel %vm1483_vm6, %v1091_v31, 0.0 }
  0xba   :  { %vm1227_vm0 = vmor %vm138_vm7, %vm238_vm14  ;;  %vm232_vm14 = vcmp.ne.s32.totalorder %v224_v30, 0 }
  0xbb   :  { %943 = vperm.xlu1 %925, %v942_v16   ;;  %488 = vperm.xlu0 %931, %v455_v17   ;;  %vm1232_vm8 = vmor %vm146_vm15, %vm246_vm4  ;;  %v887_v20 = vsel %vm1227_vm0, 1.0, %v1039_v24  ;;  %v460_v47 = vsel %vm1227_vm0, %v1091_v31, 0.0  ;;  %vm427_vm0 = vcmask 1042434  }
  0xbc   :  { %v895_v21 = vsel %vm1232_vm8, 1.0, %v1039_v24  ;;  %vm239_vm3 = vmand %vm155_vm5, %vm231_vm2  ;;  %vm140_vm5 = vcmp.gt.f32.partialorder %v1091_v31, %v84_v28 }
  0xbd   :  { %v952_v22 = vpack.i.bf16 %v895_v21, %v887_v20  ;;  %vm247_vm9 = vmand %vm163_vm11, %vm231_vm2  ;;  %vm156_vm11 = vcmp.eq.f32.partialorder %v1091_v31, %v84_v28  ;;  %vm148_vm2 = vcmp.gt.f32.partialorder %v1097_v35, %v116_v23 }
  0xbe   :  { %vm1251_vm7 = vmor %vm139_vm12, %vm239_vm3 }
  0xbf   :  { %953 = vperm.xlu1 %925, %v952_v22   ;;  %512 = vperm.xlu0 %931, %v463_v25   ;;  %vm1257_vm15 = vmor %vm147_vm10, %vm247_vm9  ;;  %v888_v32 = vsel %vm1251_vm7, 1.0, %v1039_v24  ;;  %vm1477_vm10 = vnez %v1456_v50  ;;  %vm1482_vm9 = vnez %v1454_v48  ;;  %v461_v49 = vsel %vm1251_vm7, %v1091_v31, 0.0 }
  0xc0   :  { %v896_v33 = vsel %vm1257_vm15, 1.0, %v1039_v24  ;;  %vm248_vm4 = vmand %vm164_vm1, %vm232_vm14  ;;  %v465_v37 = vsel %vm1477_vm10, %v1097_v35, 0.0  ;;  %v457_v40 = vsel %vm1482_vm9, %v1091_v31, 0.0  ;;  %vm1484_vm1 = vnez %v1462_v0 }
  0xc1   :  { %v957_v34 = vpack.i.bf16 %v896_v33, %v888_v32  ;;  %vm240_vm12 = vmand %vm156_vm11, %vm232_vm14  ;;  %v459_v45 = vsel %vm1484_vm1, %v1091_v31, 0.0  ;;  %vm1485_vm11 = vnez %v1468_v12  ;;  %vm1486_vm14 = vnez %v1464_v2 }
  0xc2   :  { %vm1280_vm13 = vmor %vm148_vm2, %vm248_vm4  ;;  %v466_v46 = vsel %vm1485_vm11, %v1097_v35, 0.0  ;;  %v467_v48 = vsel %vm1486_vm14, %v1097_v35, 0.0  ;;  %v468_v50 = vsel %vm1232_vm8, %v1097_v35, 0.0  ;;  %v469_v52 = vsel %vm1257_vm15, %v1097_v35, 0.0 }
  0xc3   :  { %491 = vperm.xlu1 %925, %v456_v26   ;;  %958 = vperm.xlu0 %931, %v957_v34   ;;  %vm1284_vm3 = vmor %vm140_vm5, %vm240_vm12  ;;  %v897_v42 = vsel %vm1280_vm13, 1.0, %v1039_v24  ;;  %v470_v53 = vsel %vm1280_vm13, %v1097_v35, 0.0  ;;  %vm425_vm8 = vcmask 1041409   ;;  %vm429_vm7 = vcmask 1043459  }
  0xc4   :  { %v889_v43 = vsel %vm1284_vm3, 1.0, %v1039_v24  ;;  %v462_v51 = vsel %vm1284_vm3, %v1091_v31, 0.0  ;;  %vm431_vm15 = vcmask 1044484   ;;  %vm433_vm2 = vcmask 1045509  }
  0xc5   :  { %v962_v44 = vpack.i.bf16 %v897_v42, %v889_v43  ;;  %vm435_vm4 = vcmask 1046534   ;;  %vm437_vm5 = vcmask 1047559   ;;  %vm448_vm12 = vcmask 64512  }
  0xc6   :  { %vm643_vm3 = vcmask 58368   ;;  %vm1040_vm9 = vmmov 0  }
  0xc7   :  { %515 = vperm.xlu1 %925, %v464_v36   ;;  %518 = vperm.xlu0 %931, %v465_v37  }
  0xc8   :  { %909 = vmatprep.mubr.msk.f32.mxu0 %vm1040_vm9, %v1039_v24  ;;  %914 = vmatprep.mubr.msk.f32.mxu1 %vm1040_vm9, %v1039_v24 }
  0xcb   :  { %494 = vperm.xlu1 %925, %v457_v40   ;;  %497 = vperm.xlu0 %931, %v458_v41  }
  0xcf   :  { %963 = vperm.xlu1 %925, %v962_v44   ;;  %500 = vperm.xlu0 %931, %v459_v45  }
  0xd3   :  { %521 = vperm.xlu1 %925, %v466_v46   ;;  %503 = vperm.xlu0 %931, %v460_v47  }
  0xd7   :  { %524 = vperm.xlu1 %925, %v467_v48   ;;  %506 = vperm.xlu0 %931, %v461_v49  }
  0xdb   :  { %527 = vperm.xlu1 %925, %v468_v50   ;;  %509 = vperm.xlu0 %931, %v462_v51  }
  0xdf   :  { %530 = vperm.xlu1 %925, %v469_v52  }
  0xe3   :  { %533 = vperm.xlu1 %925, %v470_v53  }
 0x124   :  { %v928_v54 = vpop.permute.xlu1 %927 }
 0x125   :  { %v930_v2 = vunpack.i.h.bf16 %v928_v54  ;;  %v929_v3 = vunpack.i.l.bf16 %v928_v54 }
 0x127   :  { %v368_v15 = vrot.slane %v930_v2, %v1068_v5  ;;  %v364_v16 = vrot.slane %v929_v3, %v1068_v5 }
 0x129   :  { %v426_v33 = vsel %vm425_vm8, %v368_v15, %v364_v16 }
 0x12a   :  { %v939_v56 = vpop.permute.xlu1 %938 }
 0x12b   :  { %v941_v9 = vunpack.i.h.bf16 %v939_v56  ;;  %v940_v10 = vunpack.i.l.bf16 %v939_v56 }
 0x12d   :  { %v404_v18 = vrot.slane %v941_v9, %v1068_v5  ;;  %v372_v19 = vrot.slane %v940_v10, %v1068_v5 }
 0x12e   :  { %v934_v55 = vpop.permute.xlu0 %933 }
 0x12f   :  { %v936_v62 = vunpack.i.h.bf16 %v934_v55  ;;  %v935_v63 = vunpack.i.l.bf16 %v934_v55  ;;  %v428_v34 = vsel %vm427_vm0, %v372_v19, %v426_v33 }
 0x131   :  { %v400_v7 = vrot.slane %v936_v62, %v1068_v5  ;;  %v396_v8 = vrot.slane %v935_v63, %v1068_v5 }
 0x132   :  { %v949_v57 = vpop.permute.xlu0 %948 }
 0x133   :  { %v439_v17 = vsel %vm425_vm8, %v400_v7, %v396_v8  ;;  %v951_v25 = vunpack.i.h.bf16 %v949_v57  ;;  %v950_v27 = vunpack.i.l.bf16 %v949_v57 }
 0x134   :  { %v440_v26 = vsel %vm427_vm0, %v404_v18, %v439_v17 }
 0x135   :  { %v412_v40 = vrot.slane %v951_v25, %v1068_v5  ;;  %v380_v41 = vrot.slane %v950_v27, %v1068_v5 }
 0x136   :  { %v944_v58 = vpop.permute.xlu1 %943  ;;  %v1327_v59 = vpop.permute.xlu0 %488 }
 0x137   :  { %v946_v11 = vunpack.i.h.bf16 %v944_v58  ;;  %v945_v12 = vunpack.i.l.bf16 %v944_v58  ;;  %v538_v62 = vrot.slane %v1327_v59, %v1068_v5 }
 0x139   :  { %v408_v20 = vrot.slane %v946_v11, %v1068_v5  ;;  %v376_v21 = vrot.slane %v945_v12, %v1068_v5 }
 0x13a   :  { %v954_v60 = vpop.permute.xlu1 %953  ;;  %v1329_v61 = vpop.permute.xlu0 %512 }
 0x13b   :  { %v956_v22 = vunpack.i.h.bf16 %v954_v60  ;;  %v955_v23 = vunpack.i.l.bf16 %v954_v60  ;;  %v430_v36 = vsel %vm429_vm7, %v376_v21, %v428_v34  ;;  %v441_v37 = vsel %vm429_vm7, %v408_v20, %v440_v26 }
 0x13c   :  { %v432_v49 = vsel %vm431_vm15, %v380_v41, %v430_v36  ;;  %v442_v50 = vsel %vm431_vm15, %v412_v40, %v441_v37  ;;  %v570_v20 = vrot.slane %v1329_v61, %v1068_v5 }
 0x13d   :  { %v416_v38 = vrot.slane %v956_v22, %v1068_v5  ;;  %v384_v39 = vrot.slane %v955_v23, %v1068_v5 }
 0x13e   :  { %v1331_v0 = vpop.permute.xlu1 %491  ;;  %v959_v1 = vpop.permute.xlu0 %958 }
 0x13f   :  { %v961_v28 = vunpack.i.h.bf16 %v959_v1  ;;  %v960_v29 = vunpack.i.l.bf16 %v959_v1  ;;  %v542_v48 = vrot.slane %v1331_v0, %v1068_v5  ;;  %v434_v53 = vsel %vm433_vm2, %v384_v39, %v432_v49 }
 0x140   :  { %v443_v54 = vsel %vm433_vm2, %v416_v38, %v442_v50 }
 0x141   :  { %v420_v42 = vrot.slane %v961_v28, %v1068_v5  ;;  %v388_v43 = vrot.slane %v960_v29, %v1068_v5  ;;  %v599_v3 = vsel %vm425_vm8, %v542_v48, %v538_v62 }
 0x142   :  { %v1335_v13 = vpop.permute.xlu1 %515  ;;  %v1337_v14 = vpop.permute.xlu0 %518 }
 0x143   :  { %v436_v58 = vsel %vm435_vm4, %v388_v43, %v434_v53  ;;  %v444_v60 = vsel %vm435_vm4, %v420_v42, %v443_v54  ;;  %v574_v15 = vrot.slane %v1335_v13, %v1068_v5  ;;  %v578_v23 = vrot.slane %v1337_v14, %v1068_v5 }
 0x145   :  { %v606_v13 = vsel %vm425_vm8, %v574_v15, %v570_v20 }
 0x146   :  { %v495_v30 = vpop.permute.xlu1 %494  ;;  %v498_v32 = vpop.permute.xlu0 %497  ;;  %v607_v33 = vsel %vm427_vm0, %v578_v23, %v606_v13 }
 0x147   :  { %v546_v55 = vrot.slane %v495_v30, %v1068_v5  ;;  %v550_v7 = vrot.slane %v498_v32, %v1068_v5 }
 0x149   :  { %v600_v8 = vsel %vm427_vm0, %v546_v55, %v599_v3 }
 0x14a   :  { %v964_v44 = vpop.permute.xlu1 %963  ;;  %v501_v45 = vpop.permute.xlu0 %500  ;;  %v601_v16 = vsel %vm429_vm7, %v550_v7, %v600_v8 }
 0x14b   :  { %v966_v46 = vunpack.i.h.bf16 %v964_v44  ;;  %v965_v47 = vunpack.i.l.bf16 %v964_v44  ;;  %v554_v9 = vrot.slane %v501_v45, %v1068_v5 }
 0x14d   :  { %v424_v51 = vrot.slane %v966_v46, %v1068_v5  ;;  %v392_v52 = vrot.slane %v965_v47, %v1068_v5  ;;  %v602_v17 = vsel %vm431_vm15, %v554_v9, %v601_v16 }
 0x14e   :  { %v522_v56 = vpop.permute.xlu1 %521  ;;  %v504_v57 = vpop.permute.xlu0 %503 }
 0x14f   :  { %v438_v63 = vsel %vm437_vm5, %v392_v52, %v436_v58  ;;  %v445_v0 = vsel %vm437_vm5, %v424_v51, %v444_v60  ;;  %v558_v11 = vrot.slane %v504_v57, %v1068_v5  ;;  %v582_v27 = vrot.slane %v522_v56, %v1068_v5 }
 0x150   :  { %v449_v1 = vsel %vm448_vm12, %v438_v63, 0.0  ;;  %v452_v2 = vsel %vm448_vm12, %v445_v0, 0.0 }
 0x151   :  { %450 = vadd.xlane.f32.xlu0 %v449_v1  ;;  %453 = vadd.xlane.f32.xlu1 %v452_v2  ;;  %v603_v21 = vsel %vm433_vm2, %v558_v11, %v602_v17  ;;  %v608_v34 = vsel %vm429_vm7, %v582_v27, %v607_v33 }
 0x152   :  { %v525_v10 = vpop.permute.xlu1 %524  ;;  %v507_v59 = vpop.permute.xlu0 %506 }
 0x153   :  { %v562_v12 = vrot.slane %v507_v59, %v1068_v5  ;;  %v586_v29 = vrot.slane %v525_v10, %v1068_v5 }
 0x155   :  { %v604_v25 = vsel %vm435_vm4, %v562_v12, %v603_v21  ;;  %v609_v26 = vsel %vm431_vm15, %v586_v29, %v608_v34 }
 0x156   :  { %v528_v18 = vpop.permute.xlu1 %527  ;;  %v510_v19 = vpop.permute.xlu0 %509 }
 0x157   :  { %v566_v22 = vrot.slane %v510_v19, %v1068_v5  ;;  %v590_v32 = vrot.slane %v528_v18, %v1068_v5 }
 0x159   :  { %v605_v28 = vsel %vm437_vm5, %v566_v22, %v604_v25  ;;  %v610_v37 = vsel %vm433_vm2, %v590_v32, %v609_v26 }
 0x15a   :  { %v531_v30 = vpop.permute.xlu1 %530  ;;  %v615_v61 = vsel %vm448_vm12, %v605_v28, 0.0 }
 0x15b   :  { %616 = vadd.xlane.f32.xlu0 %v615_v61  ;;  %v594_v14 = vrot.slane %v531_v30, %v1068_v5 }
 0x15d   :  { %v611_v39 = vsel %vm435_vm4, %v594_v14, %v610_v37 }
 0x15e   :  { %v534_v36 = vpop.permute.xlu1 %533 }
 0x15f   :  { %v598_v38 = vrot.slane %v534_v36, %v1068_v5 }
 0x161   :  { %v612_v40 = vsel %vm437_vm5, %v598_v38, %v611_v39 }
 0x162   :  { %v618_v41 = vsel %vm448_vm12, %v612_v40, 0.0 }
 0x163   :  { %619 = vadd.xlane.f32.xlu0 %v618_v41 }
 0x1da   :  { %v451_v42 = vpop.xlane.xlu0 %450  ;;  %v454_v44 = vpop.xlane.xlu1 %453 }
 0x1db   :  { %v621_v43 = vmul.f32 %v451_v42, %v1091_v31  ;;  %v622_v47 = vmul.f32 %v454_v44, %v1097_v35 }
 0x1dd   :  { %v623_v46 = vadd.f32 1.0, %v621_v43  ;;  %v624_v48 = vadd.f32 1.0, %v622_v47 }
 0x1e4   :  { %v617_v45 = vpop.xlane.xlu0 %616 }
 0x1e5   :  { %vm625_vm10 = vcmp.gt.f32.partialorder %v623_v46, %v617_v45 }
 0x1e6   :  { %v898_v49 = vsel %vm625_vm10, 1.0, %v1039_v24  ;;  %v647_v50 = vsel %vm625_vm10, %v1091_v31, 0.0 }
 0x1e7   :  { %v636_v54 = vrot.slane %v898_v49, %v1068_v5  ;;  %v654_v55 = vrot.slane %v647_v50, %v1068_v5 }
 0x1ec   :  { %v620_v51 = vpop.xlane.xlu0 %619 }
 0x1ed   :  { %vm626_vm13 = vcmp.gt.f32.partialorder %v624_v48, %v620_v51 }
 0x1ee   :  { %v899_v52 = vsel %vm626_vm13, 1.0, %v1039_v24  ;;  %v648_v53 = vsel %vm626_vm13, %v1097_v35, 0.0 }
 0x1ef   :  { %v640_v56 = vrot.slane %v899_v52, %v1068_v5  ;;  %v658_v57 = vrot.slane %v648_v53, %v1068_v5 }
 0x1f1   :  { %v659_v58 = vsel %vm425_vm8, %v658_v57, %v654_v55  ;;  %v641_v60 = vsel %vm425_vm8, %v640_v56, %v636_v54 }
 0x1f2   :  { %v661_v62 = vsel %vm643_vm3, %v659_v58, 0.0  ;;  %v644_v63 = vsel %vm643_vm3, %v641_v60, 0.0 }
 0x1f3   :  { %662 = vadd.xlane.f32.xlu0 %v661_v62  ;;  %645 = vadd.xlane.f32.xlu1 %v644_v63 }
 0x27c   :  { %v646_v0 = vpop.xlane.xlu1 %645  ;;  %v663_v1 = vpop.xlane.xlu0 %662 }
 0x27d   :  { %967 = vrcp.f32 %v646_v0  ;;  %v900_v2 = vadd.f32 -1.0, %v663_v1 }
 0x28a   :  { %v968_v3 = vpop.eup %967 }
 0x28b   :  { %v666_v7 = vmul.f32 %v968_v3, %v900_v2 }
 0x28d   :  { %v675_v8 = vrot.slane %v666_v7, %v1070_v6  ;;  %v671_v9 = vrot.slane %v666_v7, %v1066_v4 }
 0x28f   :  { %v679_v10 = vsub.f32 %v1097_v35, %v675_v8  ;;  %v678_v59 = vsub.f32 %v1091_v31, %v671_v9 }
 0x291   :  { %v681_v11 = vmax.f32 %v679_v10, 0.0  ;;  %v680_v12 = vmax.f32 %v678_v59, 0.0 }
 0x293   :  { %688 = vperm.xlu1 %925, %v681_v11   ;;  %685 = vperm.xlu0 %931, %v680_v12  }
 0x30e   :  { %v689_v15 = vpop.permute.xlu1 %688  ;;  %v686_v16 = vpop.permute.xlu0 %685 }
 0x30f   :  { %v697_v17 = vrot.slane %v689_v15, %v1068_v5  ;;  %v693_v6 = vrot.slane %v686_v16, %v1068_v5 }
 0x311   :  { %910 = vmatmul.mubr.msk.f32.vlgmr.msra.gmra.mxu0 %vm448_vm12, %v693_v6  ;;  %915 = vmatmul.mubr.msk.f32.vlgmr.msra.gmra.mxu1 %vm448_vm12, %v697_v17  ;;  %v698_v4 = vsel %vm425_vm8, %v697_v17, %v693_v6 }
 0x312   :  { %700 = vst.msk [vmem:[#allocation6] sm:$0x3] %vm643_vm3, %v698_v4 }
 0x313   :  { %1000 = shalt.err (!%p997_p9)
}
 0x314   :  { %871 = dma.vmem_to_hbm [thread:$0]  %s869_s20, 32, %s1442_s3, [#allocation7]   ;;  %vm850_vm6 = vcmask 254976  }
 0x315   :  { %s1042_s24 = smov [#allocation5]  }
 0x316   :  { %s858_s25 = sshll.u32 %s1042_s24, 4  ;;  %s859_s25 = int_to_ptr.vmem [resolvable:$true] %s858_s25 }
 0x317   :  { %s1009_s26 = scalar_lea.vmem %s859_s25, 32  ;;  %p1014_p11 = scmp.lt.s32.totalorder %s859_s25, %s859_s25 }
 0x318   :  { %p1010_p10 = scmp.ne.s32.totalorder %s859_s25, %s1009_s26  ;;  %p1015_p12 = scmp.lt.s32.totalorder %s1009_s26, %s1009_s26 }
 0x31a   :  { %p1016_p13 = por %p1015_p12, %p1014_p11 }
 0x31c   :  { %p1017_p0 = pnand %p1016_p13, %p1010_p10 }
 0x3d1   :  { %v769_v5 = vpop.f32.mrf.mxu0  ;;  %v841_v24 = vpop.f32.mrf.mxu1 }
 0x3d2   :  { %v847_v31 = vrot.slane %v841_v24, 7 }
 0x3d3   :  { %v911_v35 = vpop.f32.mrf.mxu0  ;;  %v916_v18 = vpop.f32.mrf.mxu1 }
 0x3d4   :  { %v848_v19 = vsel %vm425_vm8, %v847_v31, %v769_v5 }
 0x3d5   :  { %851 = vst.msk [vmem:[#allocation5] sm:$0x3] %vm850_vm6, %v848_v19 }
 0x3d6   :  { %1020 = shalt.err (!%p1017_p0)
}
 0x3d7   :  { %861 = dma.vmem_to_hbm [thread:$0]  %s859_s25, 32, %s1441_s2, [#allocation4]  }
 0x3d8   :  { %1031 = dma.done.wait [#allocation4], 32  }
 0x3d9   :  { %1032 = vsyncadd [#allocation4], 4294967264 }
 0x3da   :  { %1033 = dma.done.wait [#allocation7], 32  }
 0x3db   :  { %1034 = vsyncadd [#allocation7], 4294967264 }
 0x3dc   :  { %878 = vsyncpa [#allocation3], 1 }
 0x3dd   :  { %879 = vsyncpa [#allocation4], 1 }
 0x3de   :  { %880 = vsyncpa [#allocation7], 1 }

</bundles_post_ra>
